<compile_context>
chip_gen: v5e
topology: v5e:2x2
jax: 0.10.0
libtpu: 0.0.40
codegen_flags: <defaults>
</compile_context>

<pallas_src>
import functools

import jax
import jax.numpy as jnp
from jax.experimental import pallas as pl
from jax.experimental.pallas import tpu as pltpu


# --------------------------------------------------------------------------- #
# Hardware-aware knobs
# --------------------------------------------------------------------------- #
def _detect_vmem_limit_bytes():
    """Generation-aware scoped-VMEM limit (~96 MiB v5e/v6e, ~48 MiB v7x)."""
    cap = None
    try:
        info = pltpu.get_tpu_info()
        cap = getattr(info, "vmem_capacity_bytes", None)
    except Exception:
        cap = None
    if not cap or cap <= 0:
        cap = 64 * 1024 * 1024  # conservative (v7x per-core physical VMEM)
    return max(32 * 1024 * 1024, min(cap - 16 * 1024 * 1024, 96 * 1024 * 1024))


_VMEM_LIMIT_BYTES = _detect_vmem_limit_bytes()


def _row_tile(rows, target=512):
    """Largest row tile <= target that divides rows (multiple of 8)."""
    for t in (1024, 512, 256, 128, 64, 32, 16, 8):
        if t <= target and rows % t == 0 and rows >= t:
            return t
    return rows  # full-extent fallback (small / odd row counts)


def _col_tile(ndim, target=512):
    """Largest lane tile (multiple of 128) <= target dividing ndim, else full."""
    for t in (512, 256, 128):
        if t <= target and ndim % t == 0:
            return t
    return ndim


def _cparams(*sems):
    return pltpu.CompilerParams(
        dimension_semantics=sems,
        vmem_limit_bytes=_VMEM_LIMIT_BYTES,
    )


def _layernorm_f32(x, g, b, eps):
    mu = jnp.mean(x, axis=-1, keepdims=True)
    var = jnp.mean(jnp.square(x - mu), axis=-1, keepdims=True)
    xn = (x - mu) * jax.lax.rsqrt(var + eps)
    return xn * g + b


# --------------------------------------------------------------------------- #
# Pallas kernels
# --------------------------------------------------------------------------- #
def _embed_kernel(x_ref, w_ref, b_ref, pos_ref, o_ref):
    """o = x @ W + b + pos   (token_emb + absolute positional embedding)."""
    y = jnp.dot(x_ref[0].astype(w_ref.dtype), w_ref[...],
                preferred_element_type=jnp.float32)
    y = y + b_ref[...].astype(jnp.float32) + pos_ref[...].astype(jnp.float32)
    o_ref[0] = y.astype(o_ref.dtype)


def _attn_block_kernel(x_full_ref, x_tile_ref, g_ref, bln_ref, wqkv_ref,
                       bqkv_ref, wo_ref, bo_ref, o_ref, qkv_sc, attn_sc,
                       *, heads, dh, scale, tq, eps):
    """Fully fused pre-norm attention block for one (batch, q-tile) grid step.

    qi == 0: LayerNorm the full sequence and compute the fused Q|K|V projection
    into VMEM scratch (done once per batch element; wqkv/wo are VMEM-resident).
    Every step: per-head softmax attention for this q tile (bounded [tq, n]
    score block), out-projection and residual add, all without HBM round-trips.
    """
    qi = pl.program_id(1)
    dim = heads * dh

    @pl.when(qi == 0)
    def _():
        x = x_full_ref[0].astype(jnp.float32)                         # [n, dim]
        xn = _layernorm_f32(x, g_ref[...].astype(jnp.float32),
                            bln_ref[...].astype(jnp.float32), eps)
        qkv = jnp.dot(xn.astype(wqkv_ref.dtype), wqkv_ref[...],
                      preferred_element_type=jnp.float32)
        qkv = qkv + bqkv_ref[...].astype(jnp.float32)
        qkv_sc[...] = qkv.astype(qkv_sc.dtype)

    q0 = pl.multiple_of(qi * tq, tq)
    cdtype = qkv_sc.dtype
    for h in range(heads):  # static unrolled loop over heads
        q = qkv_sc[pl.ds(q0, tq), h * dh:(h + 1) * dh]                # [tq, dh]
        k = qkv_sc[:, dim + h * dh: dim + (h + 1) * dh]               # [n, dh]
        v = qkv_sc[:, 2 * dim + h * dh: 2 * dim + (h + 1) * dh]       # [n, dh]
        s = jax.lax.dot_general(q, k, (((1,), (1,)), ((), ())),
                                preferred_element_type=jnp.float32) * scale
        s = s - jnp.max(s, axis=-1, keepdims=True)
        p = jnp.exp(s)
        inv = pl.reciprocal(jnp.sum(p, axis=-1, keepdims=True), approx=True)
        p = p * inv
        out_h = jax.lax.dot_general(p.astype(cdtype), v,
                                    (((1,), (0,)), ((), ())),
                                    preferred_element_type=jnp.float32)
        # write each head directly into the VMEM slab (no concat keeping all
        # heads live).  TODO(synk): head-pair stores for full-128-lane slabs.
        attn_sc[:, h * dh:(h + 1) * dh] = out_h.astype(attn_sc.dtype)

    y = jnp.dot(attn_sc[...], wo_ref[...], preferred_element_type=jnp.float32)
    y = y + bo_ref[...].astype(jnp.float32) + x_tile_ref[0].astype(jnp.float32)
    o_ref[0] = y.astype(o_ref.dtype)


def _ff_block_full_kernel(x_ref, g_ref, bln_ref, w1_ref, b1_ref, w2_ref, b2_ref,
                          o_ref, *, eps):
    """Fused FF block, ff_inner untiled: LN -> ff1 -> GELU -> ff2 -> +residual.

    w1/w2 have constant index maps (VMEM-resident, fetched from HBM once per
    layer); the [tm, ff_inner] f32 GELU intermediate never touches HBM.
    """
    x = x_ref[...].astype(jnp.float32)
    xn = _layernorm_f32(x, g_ref[...].astype(jnp.float32),
                        bln_ref[...].astype(jnp.float32), eps)
    f = jnp.dot(xn.astype(w1_ref.dtype), w1_ref[...],
                preferred_element_type=jnp.float32)
    f = f + b1_ref[...].astype(jnp.float32)
    f = jax.nn.gelu(f, approximate=False)  # exact erf form (matches nn.GELU())
    y = jnp.dot(f.astype(w2_ref.dtype), w2_ref[...],
                preferred_element_type=jnp.float32)
    y = y + b2_ref[...].astype(jnp.float32) + x
    o_ref[...] = y.astype(o_ref.dtype)


def _ff_block_tiled_kernel(x_ref, g_ref, bln_ref, w1_ref, b1_ref, w2_ref,
                           b2_ref, o_ref, xn_sc, acc_sc, *, eps):
    """Fallback fused FF block with ff_inner tiled on an 'arbitrary' grid axis
    (used when the untiled working set would not fit the VMEM budget)."""
    k = pl.program_id(1)

    @pl.when(k == 0)
    def _():
        x = x_ref[...].astype(jnp.float32)
        xn = _layernorm_f32(x, g_ref[...].astype(jnp.float32),
                            bln_ref[...].astype(jnp.float32), eps)
        xn_sc[...] = xn.astype(xn_sc.dtype)
        acc_sc[...] = jnp.zeros_like(acc_sc)

    f = jnp.dot(xn_sc[...], w1_ref[...], preferred_element_type=jnp.float32)
    f = f + b1_ref[...].astype(jnp.float32)
    f = jax.nn.gelu(f, approximate=False)
    acc_sc[...] += jnp.dot(f.astype(w2_ref.dtype), w2_ref[...],
                           preferred_element_type=jnp.float32)

    @pl.when(k == pl.num_programs(1) - 1)
    def _():
        y = acc_sc[...] + b2_ref[...].astype(jnp.float32) + x_ref[...].astype(jnp.float32)
        o_ref[...] = y.astype(o_ref.dtype)


def _double_layernorm_kernel(x_ref, g1_ref, b1_ref, g2_ref, b2_ref, o_ref, *, eps):
    """Two back-to-back LayerNorms (encoder final LN + MotionTransformer.norm)."""
    x = x_ref[...].astype(jnp.float32)
    for g_ref, b_ref in ((g1_ref, b1_ref), (g2_ref, b2_ref)):
        x = _layernorm_f32(x, g_ref[...].astype(jnp.float32),
                           b_ref[...].astype(jnp.float32), eps)
    o_ref[...] = x.astype(o_ref.dtype)


# --------------------------------------------------------------------------- #
# pallas_call wrappers
# --------------------------------------------------------------------------- #
def embed(x, w, bias, pos, out_dtype):
    b, n, inp_dim = x.shape
    dim = w.shape[1]
    tn = _row_tile(n)
    return pl.pallas_call(
        _embed_kernel,
        out_shape=jax.ShapeDtypeStruct((b, n, dim), out_dtype),
        grid=(b, n // tn),
        in_specs=[
            pl.BlockSpec((1, tn, inp_dim), lambda bi, ni: (bi, ni, 0)),
            pl.BlockSpec((inp_dim, dim), lambda bi, ni: (0, 0)),
            pl.BlockSpec((1, dim), lambda bi, ni: (0, 0)),
            pl.BlockSpec((tn, dim), lambda bi, ni: (ni, 0)),  # pos reused across batch
        ],
        out_specs=pl.BlockSpec((1, tn, dim), lambda bi, ni: (bi, ni, 0)),
        compiler_params=_cparams("parallel", "parallel"),
    )(x, w, bias.reshape(1, dim), pos)


def attention_block(x, g, bln, wqkv, bqkv, wo, bo, *, heads, dh, scale, eps=1e-5):
    """x: [b, n, dim] -> LN -> QKV -> softmax attention -> out-proj -> +x."""
    b, n, dim = x.shape
    tq = _row_tile(n, target=256)
    cdtype = x.dtype
    return pl.pallas_call(
        functools.partial(_attn_block_kernel, heads=heads, dh=dh, scale=scale,
                          tq=tq, eps=eps),
        out_shape=jax.ShapeDtypeStruct((b, n, dim), cdtype),
        grid=(b, n // tq),
        in_specs=[
            # full sequence (LN + fused QKV projection, fetched once per batch)
            pl.BlockSpec((1, n, dim), lambda bi, qi: (bi, 0, 0)),
            # q-tile rows (residual add)
            pl.BlockSpec((1, tq, dim), lambda bi, qi: (bi, qi, 0)),
            pl.BlockSpec((1, dim), lambda bi, qi: (0, 0)),
            pl.BlockSpec((1, dim), lambda bi, qi: (0, 0)),
            pl.BlockSpec((dim, 3 * dim), lambda bi, qi: (0, 0)),   # VMEM-resident
            pl.BlockSpec((1, 3 * dim), lambda bi, qi: (0, 0)),
            pl.BlockSpec((dim, dim), lambda bi, qi: (0, 0)),       # VMEM-resident
            pl.BlockSpec((1, dim), lambda bi, qi: (0, 0)),
        ],
        out_specs=pl.BlockSpec((1, tq, dim), lambda bi, qi: (bi, qi, 0)),
        scratch_shapes=[
            pltpu.VMEM((n, 3 * dim), cdtype),   # fused QKV for the whole sequence
            pltpu.VMEM((tq, dim), cdtype),      # per-q-tile head outputs
        ],
        compiler_params=_cparams("parallel", "arbitrary"),
    )(x, x, g.reshape(1, dim), bln.reshape(1, dim),
      wqkv, bqkv.reshape(1, 3 * dim), wo, bo.reshape(1, dim))


def ff_block(x, g, bln, w1, b1, w2, b2, eps=1e-5):
    rows, dim = x.shape
    ff_inner = w1.shape[1]
    tm = _row_tile(rows)
    wbytes = jnp.dtype(w1.dtype).itemsize
    abytes = jnp.dtype(x.dtype).itemsize
    # rough per-step working set for the untiled layout (weights double-buffered
    # defensively, f32 GELU intermediate x2 for headroom)
    est = (4 * dim * ff_inner * wbytes
           + 4 * tm * dim * abytes
           + 2 * tm * ff_inner * 4)
    if est <= int(0.6 * _VMEM_LIMIT_BYTES):
        # untiled ff_inner: FF weights resident, no accumulator phases
        return pl.pallas_call(
            functools.partial(_ff_block_full_kernel, eps=eps),
            out_shape=jax.ShapeDtypeStruct((rows, dim), x.dtype),
            grid=(rows // tm,),
            in_specs=[
                pl.BlockSpec((tm, dim), lambda i: (i, 0)),
                pl.BlockSpec((1, dim), lambda i: (0, 0)),
                pl.BlockSpec((1, dim), lambda i: (0, 0)),
                pl.BlockSpec((dim, ff_inner), lambda i: (0, 0)),
                pl.BlockSpec((1, ff_inner), lambda i: (0, 0)),
                pl.BlockSpec((ff_inner, dim), lambda i: (0, 0)),
                pl.BlockSpec((1, dim), lambda i: (0, 0)),
            ],
            out_specs=pl.BlockSpec((tm, dim), lambda i: (i, 0)),
            compiler_params=_cparams("parallel"),
        )(x, g.reshape(1, dim), bln.reshape(1, dim),
          w1, b1.reshape(1, ff_inner), w2, b2.reshape(1, dim))

    # fallback: ff_inner tiled with an f32 VMEM accumulator (tight-VMEM chips /
    # very large dims)
    tk = _col_tile(ff_inner)
    return pl.pallas_call(
        functools.partial(_ff_block_tiled_kernel, eps=eps),
        out_shape=jax.ShapeDtypeStruct((rows, dim), x.dtype),
        grid=(rows // tm, ff_inner // tk),
        in_specs=[
            pl.BlockSpec((tm, dim), lambda i, k: (i, 0)),
            pl.BlockSpec((1, dim), lambda i, k: (0, 0)),
            pl.BlockSpec((1, dim), lambda i, k: (0, 0)),
            pl.BlockSpec((dim, tk), lambda i, k: (0, k)),
            pl.BlockSpec((1, tk), lambda i, k: (0, k)),
            pl.BlockSpec((tk, dim), lambda i, k: (k, 0)),
            pl.BlockSpec((1, dim), lambda i, k: (0, 0)),
        ],
        out_specs=pl.BlockSpec((tm, dim), lambda i, k: (i, 0)),
        scratch_shapes=[
            pltpu.VMEM((tm, dim), x.dtype),      # LayerNormed input (compute dtype)
            pltpu.VMEM((tm, dim), jnp.float32),  # f32 accumulator for ff2
        ],
        compiler_params=_cparams("parallel", "arbitrary"),
    )(x, g.reshape(1, dim), bln.reshape(1, dim),
      w1, b1.reshape(1, ff_inner), w2, b2.reshape(1, dim))


def double_layernorm(x, g1, b1, g2, b2, out_dtype, eps=1e-5):
    rows, d = x.shape
    tm = _row_tile(rows, target=1024)
    return pl.pallas_call(
        functools.partial(_double_layernorm_kernel, eps=eps),
        out_shape=jax.ShapeDtypeStruct((rows, d), out_dtype),
        grid=(rows // tm,),
        in_specs=[
            pl.BlockSpec((tm, d), lambda i: (i, 0)),
            pl.BlockSpec((1, d), lambda i: (0, 0)),
            pl.BlockSpec((1, d), lambda i: (0, 0)),
            pl.BlockSpec((1, d), lambda i: (0, 0)),
            pl.BlockSpec((1, d), lambda i: (0, 0)),
        ],
        out_specs=pl.BlockSpec((tm, d), lambda i: (i, 0)),
        compiler_params=_cparams("parallel"),
    )(x, g1.reshape(1, d), b1.reshape(1, d), g2.reshape(1, d), b2.reshape(1, d))


# --------------------------------------------------------------------------- #
# Parameter construction (deterministic, synthetic)
# --------------------------------------------------------------------------- #
def init_params(key, *, inp_dim, dim, max_seq_len, depth, heads, ff_mult,
                dtype=jnp.bfloat16):
    """Weights/biases in `dtype` (bf16 for MXU efficiency); LN params in f32."""
    ff_inner = dim * ff_mult
    keys = iter(jax.random.split(key, 8 + depth * 8))

    def nrm(shape, std):
        return (std * jax.random.normal(next(keys), shape, jnp.float32)).astype(dtype)

    params = {
        "heads": heads,
        # token_emb: kaiming_normal_ (l2norm_embed=False) -> std = sqrt(2/fan_in)
        "token_w": nrm((inp_dim, dim), (2.0 / inp_dim) ** 0.5),
        "token_b": jnp.zeros((dim,), dtype),
        # AbsolutePositionalEmbedding: nn.Embedding(max_seq_len, dim), scale = dim**-0.5
        "pos_table": jax.random.normal(next(keys), (max_seq_len, dim), jnp.float32),
        "pos_scale": dim ** -0.5,
        "attn_final_g": jnp.ones((dim,), jnp.float32),
        "attn_final_b": jnp.zeros((dim,), jnp.float32),
        "norm_g": jnp.ones((dim,), jnp.float32),
        "norm_b": jnp.zeros((dim,), jnp.float32),
        "layers": [],
    }
    w_std = 0.02
    for _ in range(depth):
        params["layers"].append({
            "ln1_g": jnp.ones((dim,), jnp.float32),
            "ln1_b": jnp.zeros((dim,), jnp.float32),
            # fused Q|K|V projection
            "wqkv": nrm((dim, 3 * dim), w_std),
            "bqkv": jnp.zeros((3 * dim,), dtype),
            "wo": nrm((dim, dim), w_std),
            "bo": jnp.zeros((dim,), dtype),
            "ln2_g": jnp.ones((dim,), jnp.float32),
            "ln2_b": jnp.zeros((dim,), jnp.float32),
            "wff1": nrm((dim, ff_inner), w_std),
            "bff1": jnp.zeros((ff_inner,), dtype),
            "wff2": nrm((ff_inner, dim), w_std),
            "bff2": jnp.zeros((dim,), dtype),
        })
    return params


# --------------------------------------------------------------------------- #
# Forward pass
# --------------------------------------------------------------------------- #
def motion_transformer_forward(x, params):
    b, n, inp_dim = x.shape
    dim = params["token_w"].shape[1]
    heads = params["heads"]
    dh = dim // heads
    rows = b * n
    act_dtype = params["token_w"].dtype

    # x = token_emb(x) + pos_emb  (fused kernel; pos streamed per seq-tile,
    # never broadcast to [rows, dim] in HBM)
    pos = (params["pos_table"][:n] * params["pos_scale"]).astype(act_dtype)  # [n, dim]
    h = embed(x, params["token_w"], params["token_b"], pos, act_dtype)       # [b, n, dim]

    # post_emb_norm = Identity, emb_dropout(p=0) = Identity, project_emb = Identity
    scale = dh ** -0.5
    for layer in params["layers"]:
        # ---- pre-norm self-attention + residual (single fused kernel) ----
        h = attention_block(h, layer["ln1_g"], layer["ln1_b"],
                            layer["wqkv"], layer["bqkv"],
                            layer["wo"], layer["bo"],
                            heads=heads, dh=dh, scale=scale)                  # [b, n, dim]

        # ---- pre-norm feedforward + residual (single fused kernel) ----
        h = ff_block(h.reshape(rows, dim), layer["ln2_g"], layer["ln2_b"],
                     layer["wff1"], layer["bff1"],
                     layer["wff2"], layer["bff2"]).reshape(b, n, dim)

    # encoder final LayerNorm + MotionTransformer.norm fused into one kernel
    out = double_layernorm(h.reshape(rows, dim),
                           params["attn_final_g"], params["attn_final_b"],
                           params["norm_g"], params["norm_b"],
                           out_dtype=jnp.float32)
    # logits_dim is None -> return_embeddings=True -> return normed embeddings
    return out.reshape(b, n, dim)


# --------------------------------------------------------------------------- #
if __name__ == "__main__":
    # small shapes consistent with the module: x is [batch, seq, inp_dim]
    B, N, INP_DIM = 2, 8, 4
    DIM, HEADS, DEPTH, FF_MULT, MAX_SEQ_LEN = 32, 4, 2, 4, 16

    key = jax.random.PRNGKey(0)
    k_x, k_p = jax.random.split(key)
    x = jax.random.normal(k_x, (B, N, INP_DIM), jnp.float32)
    params = init_params(k_p, inp_dim=INP_DIM, dim=DIM, max_seq_len=MAX_SEQ_LEN,
                         depth=DEPTH, heads=HEADS, ff_mult=FF_MULT)

    out = motion_transformer_forward(x, params)
    out = jax.block_until_ready(out)
    assert out.shape == (B, N, DIM) and out.dtype == jnp.float32
    assert bool(jnp.all(jnp.isfinite(out)))
    print("KERNEL_OK")
</pallas_src>

<mosaic_0001>
module attributes {stable_mosaic.version = 11 : i64} {
  func.func @_embed_kernel(%arg0: i32, %arg1: i32, %arg2: memref<1x8x4xf32, #tpu.memory_space<vmem>>, %arg3: memref<4x32xbf16, #tpu.memory_space<vmem>>, %arg4: memref<1x32xbf16, #tpu.memory_space<vmem>>, %arg5: memref<8x32xbf16, #tpu.memory_space<vmem>>, %arg6: memref<1x8x32xbf16, #tpu.memory_space<vmem>>) attributes {dimension_semantics = [#tpu.dimension_semantics<parallel>, #tpu.dimension_semantics<parallel>], iteration_bounds = array<i64: 2, 1>, scalar_prefetch = 0 : i64, scratch_operands = 0 : i64, tpu.core_type = #tpu.core_type<tc>, window_params = [{transform_indices = @transform_0, window_bounds = array<i64: 1, 8, 4>}, {pipeline_mode = #tpu.pipeline_mode<synchronous>, transform_indices = @transform_1, window_bounds = array<i64: 4, 32>}, {pipeline_mode = #tpu.pipeline_mode<synchronous>, transform_indices = @transform_2, window_bounds = array<i64: 1, 32>}, {transform_indices = @transform_3, window_bounds = array<i64: 8, 32>}, {transform_indices = @transform_4, window_bounds = array<i64: 1, 8, 32>}]} {
    %c0 = arith.constant 0 : index
    %c0_0 = arith.constant 0 : index
    %c0_1 = arith.constant 0 : index
    %0 = vector.load %arg2[%c0, %c0_0, %c0_1] : memref<1x8x4xf32, #tpu.memory_space<vmem>>, vector<1x8x4xf32>
    %1 = vector.shape_cast %0 : vector<1x8x4xf32> to vector<8x4xf32>
    %2 = arith.truncf %1 : vector<8x4xf32> to vector<8x4xbf16>
    %c0_2 = arith.constant 0 : index
    %c0_3 = arith.constant 0 : index
    %3 = vector.load %arg3[%c0_2, %c0_3] : memref<4x32xbf16, #tpu.memory_space<vmem>>, vector<4x32xbf16>
    %cst = arith.constant dense<0.000000e+00> : vector<8x32xf32>
    %4 = tpu.matmul %2, %3, %cst {dimension_numbers = #tpu.dot_dimension_numbers<[1], [0], [0], [1], [0, 0, 1, 1], [], []>} : vector<8x4xbf16>, vector<4x32xbf16>, vector<8x32xf32> -> vector<8x32xf32>
    %c0_4 = arith.constant 0 : index
    %c0_5 = arith.constant 0 : index
    %5 = vector.load %arg4[%c0_4, %c0_5] : memref<1x32xbf16, #tpu.memory_space<vmem>>, vector<1x32xbf16>
    %6 = arith.extf %5 : vector<1x32xbf16> to vector<1x32xf32>
    %7 = vector.broadcast %6 : vector<1x32xf32> to vector<8x32xf32>
    %8 = arith.addf %4, %7 : vector<8x32xf32>
    %c0_6 = arith.constant 0 : index
    %c0_7 = arith.constant 0 : index
    %9 = vector.load %arg5[%c0_6, %c0_7] : memref<8x32xbf16, #tpu.memory_space<vmem>>, vector<8x32xbf16>
    %10 = arith.extf %9 : vector<8x32xbf16> to vector<8x32xf32>
    %11 = arith.addf %8, %10 : vector<8x32xf32>
    %12 = arith.truncf %11 : vector<8x32xf32> to vector<8x32xbf16>
    %c0_8 = arith.constant 0 : index
    %c0_9 = arith.constant 0 : index
    %c0_10 = arith.constant 0 : index
    %13 = vector.load %arg6[%c0_8, %c0_9, %c0_10] : memref<1x8x32xbf16, #tpu.memory_space<vmem>>, vector<1x8x32xbf16>
    %14 = vector.shape_cast %13 : vector<1x8x32xbf16> to vector<8x32xbf16>
    %15 = vector.shape_cast %12 : vector<8x32xbf16> to vector<1x8x32xbf16>
    tpu.vector_store %arg6[%c0_8, %c0_9, %c0_10], %15 {strides = array<i32>} : memref<1x8x32xbf16, #tpu.memory_space<vmem>>, vector<1x8x32xbf16>,
    return
  }
  func.func @transform_0(%arg0: i32, %arg1: i32) -> (i32, i32, i32) {
    %c0_i32 = arith.constant 0 : i32
    %c0_i32_0 = arith.constant 0 : i32
    return %arg0, %arg1, %c0_i32 : i32, i32, i32
  }
  func.func @transform_1(%arg0: i32, %arg1: i32) -> (i32, i32) {
    %c0_i32 = arith.constant 0 : i32
    %c0_i32_0 = arith.constant 0 : i32
    %c0_i32_1 = arith.constant 0 : i32
    return %c0_i32, %c0_i32_0 : i32, i32
  }
  func.func @transform_2(%arg0: i32, %arg1: i32) -> (i32, i32) {
    %c0_i32 = arith.constant 0 : i32
    %c0_i32_0 = arith.constant 0 : i32
    %c0_i32_1 = arith.constant 0 : i32
    return %c0_i32, %c0_i32_0 : i32, i32
  }
  func.func @transform_3(%arg0: i32, %arg1: i32) -> (i32, i32) {
    %c0_i32 = arith.constant 0 : i32
    %c0_i32_0 = arith.constant 0 : i32
    return %arg1, %c0_i32 : i32, i32
  }
  func.func @transform_4(%arg0: i32, %arg1: i32) -> (i32, i32, i32) {
    %c0_i32 = arith.constant 0 : i32
    %c0_i32_0 = arith.constant 0 : i32
    return %arg0, %arg1, %c0_i32 : i32, i32, i32
  }
}

</mosaic_0001>

<bundles_post_ra>
// kernel: tpu_custom_call.1
= control target key start
LH: loop header
LB: loop body
LE: loop exit
PB: predicated region body
PF: predicated region fallthrough
CT: control target
= control target key end

     0   :  { %9 = vsyncpa [#allocation3], 0  ;;  %s651_s0 = inlined_call_operand.vmem [shape: f32[2,8,4], index: 0, kind: input, shape index: {}]   ;;  %s652_s1 = inlined_call_operand.vmem [shape: bf16[4,32], index: 1, kind: input, shape index: {}]   ;;  %s653_s2 = inlined_call_operand.vmem [shape: bf16[1,32], index: 2, kind: input, shape index: {}]   ;;  %s654_s3 = inlined_call_operand.vmem [shape: bf16[8,32], index: 3, kind: input, shape index: {}]   ;;  %s655_s4 = inlined_call_operand.hbm [shape: bf16[2,8,32], index: 4, kind: output, shape index: {}]  }
   0x1   :  { %11 = vsyncpa [#allocation3 + $0x1], 0  ;;  %s545_s15 = smov 0   ;;  %s547_s16 = smov 0  }
   0x2   :  { %s549_s17 = smov 0   ;;  %s551_s18 = smov 0  }
   0x3   :  { %s553_s19 = smov 0   ;;  %s555_s20 = smov 0  }
   0x4 LB: > { %s372_s21 = sadd.s32 4294967295, %s518_s20   ;;  %s373_s22 = sadd.s32 4294967294, %s518_s20   ;;  %s518_s20 = sphi %s555_s20, %s17_s20   ;;  %s514_s19 = sphi %s553_s19, %s662_s19   ;;  %s510_s18 = sphi %s551_s18, %s661_s18   ;;  %s506_s17 = sphi %s549_s17, %s660_s17   ;;  %s502_s16 = sphi %s547_s16, %s659_s16   ;;  %s498_s15 = sphi %s545_s15, %s658_s15  }
   0x5   : > { %s29_s23 = sadd.s32 1, %s514_s19  ;;  %s134_s24 = sadd.s32 1, %s506_s17 }
   0x6   : > { %p31_p0 = scmp.ge.s32.totalorder %s29_s23, 2  ;;  %p144_p1 = scmp.ne.s32.totalorder %s506_s17, %s502_s16 }
   0x7   : > { %p145_p2 = scmp.eq.s32.totalorder %s372_s21, 1  ;;  %p150_p3 = scmp.ne.s32.totalorder %s502_s16, %s498_s15 }
   0x8   : > { %s664_s23 = smov (%p31_p0, %s29_s23), 0  ;;  %p151_p5 = scmp.eq.s32.totalorder %s373_s22, 1 }
   0x9   : > { %p585_p4 = por %p145_p2, %p144_p1  ;;  %s129_s26 = ssub.s32 %s514_s19, %s664_s23 }
   0xa   : > { %p377_p6 = scmp.ge.s32.totalorder %s518_s20, 1  ;;  %p132_p7 = scmp.eq.s32.totalorder %s129_s26, 0 }
   0xb   : > { %p592_p8 = por %p151_p5, %p150_p3  ;;  %p192_p9 = scmp.lt.s32.totalorder %s518_s20, 3 }
   0xc   : > { %s598_s28 = scalar_select %p132_p7, %s506_s17, %s134_s24  }
   0xd   : > { %p193_p10 = pnand %p377_p6, %p192_p9 }
   0xe   : > { %p224_p11 = scmp.lt.s32.totalorder (!%p193_p10), %s510_s18, 1  ;;  %s221_s12 = sand.u32 (!%p193_p10), 1, %s502_s16  }
   0xf   : > { %196 = sbr.rel (%p193_p10) target bundleno = 163 (0xa3), region = 36  ;;  %s378_s21 = sshll.u32 (!%p193_p10), %s221_s12, 2 }
  0x10   : > { %s382_s22 = sshll.u32 (!%p193_p10), %s510_s18, 2  ;;  %s223_s30 = scalar_lea.vmem (!%p193_p10), [#allocation2], %s378_s21 }
  0x11   : > { %s281_s29 = scalar_lea.hbm (!%p193_p10), %s655_s4, %s382_s22  ;;  %s460_s11 = scalar_lea.hbm (!%p193_p10), %s655_s4, 8 }
  0x14   : > { %v238_v0 = vld [vmem:[%s652_s1] sm:$0x3]  ;;  %vm246_vm0 = vcmask 1041408   ;;  %s225_s5 = scalar_select %p224_p11, %s510_s18, 1  ;;  %vm242_vm1 = vcmask 31744   ;;  %vm267_vm2 = vcmask 257024  }
  0x15   : > { %v248_v1 = vsel %vm246_vm0, %v238_v0, 0  ;;  %v239_v4 = vld [vmem:[%s653_s2] sm:$0x1]  ;;  %s270_s18 = scalar_lea.sflag [#allocation3], %s221_s12 }
  0x16   : > { %257 = vmatpush.bf16.msra.mxu0 %v248_v1  ;;  %s379_s6 = sshll.u32 %s225_s5, 3  ;;  %v240_v5 = vunpack.c.l.bf16 %v239_v4  ;;  %v263_v6 = vld [vmem:[%s654_s3] sm:$0xf]  ;;  %s283_s5 = sshll.u32 %s223_s30, 4  ;;  %s284_s5 = int_to_ptr.vmem [resolvable:$true] %s283_s5 }
  0x17   : > { %s230_s9 = scalar_lea.vmem %s651_s0, %s379_s6  ;;  %v264_v8 = vunpack.c.l.bf16 %v263_v6  ;;  %s285_s6 = sshll.u32 %s281_s29, 4  ;;  %s286_s6 = int_to_ptr.hbm [resolvable:$true] %s285_s6 }
  0x18   : > { %v236_v2 = vld [vmem:[%s230_s9] sm:$0xff]  ;;  %v241_v7 = vperm.slane %v240_v5, 0  ;;  %s454_s7 = sshra.s32 %s286_s6, 4  ;;  %s455_s7 = int_to_ptr.hbm [resolvable:$true] %s454_s7 }
  0x19   : > { %v237_v3 = vpack.c.bf16 %v236_v2, %v236_v2  ;;  %s456_s8 = scalar_lea.hbm %s455_s7, 4  ;;  %p461_p1 = scmp.lt.s32.totalorder %s455_s7, %s655_s4 }
  0x1a   : > { %p457_p12 = scmp.ne.s32.totalorder %s455_s7, %s456_s8  ;;  %p462_p2 = scmp.lt.s32.totalorder %s460_s11, %s456_s8 }
  0x1b   : > { %380 = vmatmul.msk.bf16.vlgmr.msra.gmra.mxu0 %vm242_vm1, %v237_v3 }
  0x1c   : > { %p458_p13 = pnand %p457_p12, %p585_p4  ;;  %p463_p3 = por %p462_p2, %p461_p1 }
  0x1e   : > { %p459_p0 = pneg %p458_p13 }
  0x20   : > { %p464_p5 = pnand %p463_p3, %p459_p0 }
  0x98   : > { %v259_v9 = vpop.f32.mrf.mxu0 }
  0x99   : > { %v260_v10 = vadd.f32 %v259_v9, %v241_v7 }
  0x9b   : > { %v265_v11 = vadd.f32 %v264_v8, %v260_v10 }
  0x9d   : > { %v266_v12 = vpack.c.bf16 %v265_v11, %v265_v11 }
  0x9f   : > { %268 = vst.msk [vmem:[%s223_s30] sm:$0xf] %vm267_vm2, %v266_v12 }
  0xa0   : > { %v261_v13 = vpop.f32.mrf.mxu0 }
  0xa1   : > { %467 = shalt.err (!%p464_p5)
}
  0xa2   : > { %385 = dma.vmem_to_hbm [thread:$0]  (%p585_p4), %s284_s5, 64, %s286_s6, %s270_s18  }
  0xa3 PF: > { %p391_p6 = scmp.ge.s32.totalorder %s518_s20, 2  ;;  %s297_s12 = sand.u32 1, %s498_s15  }
  0xa4   : > { %s298_s21 = scalar_lea.sflag [#allocation3], %s297_s12 }
  0xa5   : > { %p388_p7 = pnand %p391_p6, %p592_p8 }
  0xa7   : > { %p389_p9 = pneg %p388_p7 }
  0xa9   : > { %493 = dma.done.wait (%p389_p9), %s298_s21, 64  }
  0xaa   : > { %495 = vsyncadd (%p389_p9), %s298_s21, 4294967232  ;;  %s17_s20 = sadd.s32 1, %s518_s20   ;;  %s658_s15 = smov %s502_s16 }
  0xab   : > { %p14_p10 = scmp.ge.s32.totalorder %s17_s20, 4   ;;  %s659_s16 = smov %s506_s17 }
  0xac   : > { %s660_s17 = smov %s598_s28  ;;  %s661_s18 = smov %s514_s19 }
  0xad   : > { %s662_s19 = smov %s664_s23  ;;  %16 = sbr.rel (!%p14_p10) target bundleno = 4 (0x4), region = 74 }
  0xb2   :  { %304 = vsyncpa [#allocation3], 1 }
  0xb3   :  { %306 = vsyncpa [#allocation3 + $0x1], 1 }

</bundles_post_ra>
